<compile_context>
chip_gen: v7x
topology: tpu7x:2x2x1
jax: 0.10.0
libtpu: 0.0.40
codegen_flags: <defaults>
</compile_context>

<pallas_src>
import functools

import jax
import jax.numpy as jnp
from jax import lax
from jax.experimental import pallas as pl
from jax.experimental.pallas import tpu as pltpu

_LANE = 128
_SUBLANE = 8
_TILE_R_CAP = 1024          # rows of 128 lanes per block (bounds temporaries/code size)


def _round_up(x, m):
    return ((x + m - 1) // m) * m


def _sublane_align(dtype):
    # Rows-of-128 alignment so packed dtypes (bf16: 16, int8/bool: 32) tile natively.
    return max(_SUBLANE, 32 // jnp.dtype(dtype).itemsize)


def _chip_params():
    kind = ""
    try:
        kind = jax.devices()[0].device_kind.lower()
    except Exception:
        pass
    if "v7" in kind:
        # v7x: 64 MiB VMEM / TC, 2 TensorCores -> split the reduction axis, stay lean.
        return {"num_splits": 2, "vmem_limit": 48 * 1024 * 1024,
                "budget": 20 * 1024 * 1024}
    if "v5" in kind or "v6" in kind:
        # v5e/v6e: single TC, 128 MiB VMEM -> large tiles, no split.
        return {"num_splits": 1, "vmem_limit": 96 * 1024 * 1024,
                "budget": 40 * 1024 * 1024}
    # Unknown / older generation: conservative defaults.
    return {"num_splits": 1, "vmem_limit": None, "budget": 8 * 1024 * 1024}


def _choose_tile_r(tn, r, r_align, itemsizes, budget_bytes):
    """Largest r_align-multiple row tile whose footprint fits the VMEM budget.

    Footprint per element: 2 pipeline buffers per input (actual itemsize, so bf16/int8
    tiles grow accordingly) + ~4 f32 compute temporaries.
    """
    bytes_per_elem = 2 * sum(itemsizes) + 4 * 4
    max_elems = max(budget_bytes // bytes_per_elem, tn * _LANE * r_align)
    t = (max_elems // (tn * _LANE)) // r_align * r_align
    t = max(t, r_align)
    return int(min(t, r, _TILE_R_CAP))


def _dice_partial_kernel(pred_ref, targ_ref, num_ref, den_ref, *,
                         r_total, tile_r, k_per_split, mask_needed, p_exp):
    s = pl.program_id(1)     # core-split index (parallel; size 1 on v5e/v6e)
    k = pl.program_id(2)     # reduction-tile index within this split (arbitrary)

    @pl.when(k == 0)
    def _():
        num_ref[...] = jnp.zeros_like(num_ref)
        den_ref[...] = jnp.zeros_like(den_ref)

    # Upcast BEFORE multiplying so bf16/int8 inputs accumulate in f32.
    pr = pred_ref[...].astype(jnp.float32)       # (tn, tile_r, 128)
    tg = targ_ref[...].astype(jnp.float32)

    if mask_needed:
        # Global (unclamped) row-of-128 index; zero rows >= R.  Covers both the
        # overhanging tail tile and fully duplicated (clamped) tiles on a split.
        start_r = (s * k_per_split + k) * tile_r
        ridx = lax.broadcasted_iota(jnp.int32, pr.shape, 1) + start_r
        valid = ridx < r_total
        pr = jnp.where(valid, pr, 0.0)
        tg = jnp.where(valid, tg, 0.0)

    prod = pr * tg
    if p_exp == 2:
        sq = pr * pr + tg * tg
    else:
        sq = pr ** p_exp + tg ** p_exp

    # Sublane-group-aligned regroup (whole (8,128) tiles only) + VPU add-reduce into
    # the resident (tn, 8, 128) partial-sum block; the final cross-sublane/lane reduce
    # is deferred to the wrapper.
    tn = pr.shape[0]
    g = tile_r // _SUBLANE
    num_ref[...] += jnp.sum(prod.reshape(tn, g, _SUBLANE, _LANE), axis=1)
    den_ref[...] += jnp.sum(sq.reshape(tn, g, _SUBLANE, _LANE), axis=1)


def _apply_reduction(loss, reduction):
    if reduction == "mean":
        return loss.mean()
    elif reduction == "sum":
        return loss.sum()
    elif reduction == "none":
        return loss
    raise Exception("Unexpected reduction {}".format(reduction))


def binary_dice_loss(predict, target, *, smooth=1.0, p=2, reduction="mean",
                     pred_dtype=None, target_dtype=None,
                     tile_r=None, batch_block=None, num_splits=None):
    assert predict.shape[0] == target.shape[0], "predict & target batch size don't match"
    n = predict.shape[0]
    pred2d = predict.reshape(n, -1)
    targ2d = target.reshape(n, -1)
    # Optional HBM-bandwidth saver: stream narrower dtypes (kernel upcasts to f32).
    if pred_dtype is not None:
        pred2d = pred2d.astype(pred_dtype)
    if target_dtype is not None:
        targ2d = targ2d.astype(target_dtype)
    d = pred2d.shape[1]
    assert d < 2 ** 31, "per-sample feature dim must fit in int32 indices"

    if d == 0:
        # Sums are 0 -> num = den = smooth -> loss = 1 - 2 = -1 per sample.
        loss = jnp.full((n,), 1.0 - 2.0 * smooth / smooth, dtype=jnp.float32)
        return _apply_reduction(loss, reduction)

    chip = _chip_params()
    if num_splits is None:
        num_splits = chip["num_splits"]

    r_align = max(_sublane_align(pred2d.dtype), _sublane_align(targ2d.dtype))
    d_pad = _round_up(d, r_align * _LANE)
    if d_pad != d:
        # Zero padding is exact for both sum(p*t) and sum(p^p + t^p).
        # TODO(synk): for huge non-conforming D switch to in-kernel lane masking
        # instead of this wrapper pad (extra HBM round trip).
        pred2d = jnp.pad(pred2d, ((0, 0), (0, d_pad - d)))
        targ2d = jnp.pad(targ2d, ((0, 0), (0, d_pad - d)))
    r = d_pad // _LANE
    pred3d = pred2d.reshape(n, r, _LANE)
    targ3d = targ2d.reshape(n, r, _LANE)

    tn = batch_block if batch_block is not None else min(n, 128)
    tn = max(1, min(tn, n))
    if tile_r is None:
        tile_r = _choose_tile_r(
            tn, r, r_align,
            (pred2d.dtype.itemsize, targ2d.dtype.itemsize),
            chip["budget"])
    assert tile_r % r_align == 0 and tile_r <= r, (tile_r, r_align, r)

    num_r_tiles = pl.cdiv(r, tile_r)
    k_per_split = pl.cdiv(num_r_tiles, num_splits)
    mask_needed = (num_splits * k_per_split * tile_r) != r   # tail and/or split dup
    num_n_blocks = pl.cdiv(n, tn)
    n_pad_out = num_n_blocks * tn                            # extra rows sliced off below
    grid = (num_n_blocks, num_splits, k_per_split)

    def in_map(nb, s, k):
        # Clamp so no block starts entirely past R; duplicated blocks are fully
        # masked inside the kernel (contribute zero).
        return (nb, jnp.minimum(s * k_per_split + k, num_r_tiles - 1), 0)

    def out_map(nb, s, k):
        return (s, nb, 0, 0)

    kernel = functools.partial(
        _dice_partial_kernel, r_total=r, tile_r=tile_r,
        k_per_split=k_per_split, mask_needed=mask_needed, p_exp=p)

    cp = dict(dimension_semantics=("parallel", "parallel", "arbitrary"))
    if chip["vmem_limit"] is not None:
        cp["vmem_limit_bytes"] = chip["vmem_limit"]

    num_part, den_part = pl.pallas_call(
        kernel,
        out_shape=(
            jax.ShapeDtypeStruct((num_splits, n_pad_out, _SUBLANE, _LANE), jnp.float32),
            jax.ShapeDtypeStruct((num_splits, n_pad_out, _SUBLANE, _LANE), jnp.float32),
        ),
        grid_spec=pltpu.PrefetchScalarGridSpec(
            num_scalar_prefetch=0,
            grid=grid,
            in_specs=[
                # TODO(synk): sweep pipeline_mode=pl.Buffered(3) on 128 MiB parts.
                pl.BlockSpec((tn, tile_r, _LANE), in_map),
                pl.BlockSpec((tn, tile_r, _LANE), in_map),
            ],
            out_specs=[
                pl.BlockSpec((None, tn, _SUBLANE, _LANE), out_map),
                pl.BlockSpec((None, tn, _SUBLANE, _LANE), out_map),
            ],
        ),
        compiler_params=pltpu.CompilerParams(**cp),
    )(pred3d, targ3d)

    # Tiny finalize in plain JAX: cross-split + cross-sublane + cross-lane reduce,
    # dice, reduction.  (Rows >= n of the padded partials hold garbage; sliced off.)
    num = jnp.sum(num_part[:, :n], axis=(0, 2, 3)) + smooth   # [N]
    den = jnp.sum(den_part[:, :n], axis=(0, 2, 3)) + smooth   # [N]
    loss = 1.0 - 2.0 * num / den                              # [N]
    return _apply_reduction(loss, reduction)


def _reference(predict, target, smooth=1.0, p=2, reduction="mean"):
    n = predict.shape[0]
    p2 = predict.reshape(n, -1).astype(jnp.float32)
    t2 = target.reshape(n, -1).astype(jnp.float32)
    num = jnp.sum(p2 * t2, axis=1) + smooth
    den = jnp.sum(p2 ** p + t2 ** p, axis=1) + smooth
    loss = 1.0 - 2.0 * num / den
    return _apply_reduction(loss, reduction)


if __name__ == "__main__":
    key = jax.random.PRNGKey(0)
    k1, k2, k3, k4 = jax.random.split(key, 4)

    # Case 1: canonical small shape, f32, exact module semantics.
    predict = jax.nn.sigmoid(jax.random.normal(k1, (2, 4, 16, 16), jnp.float32))
    target = (jax.random.uniform(k2, (2, 4, 16, 16)) > 0.5).astype(jnp.float32)
    out = jax.block_until_ready(binary_dice_loss(predict, target))
    ref = _reference(predict, target)
    assert jnp.allclose(out, ref, atol=1e-5, rtol=1e-5), (out, ref)

    # Case 2: per-sample dim not a multiple of 128 (pad path) + reduction='none'.
    p2 = jax.nn.sigmoid(jax.random.normal(k3, (3, 5, 7), jnp.float32))
    t2 = (jax.random.uniform(k4, (3, 5, 7)) > 0.5).astype(jnp.float32)
    out2 = jax.block_until_ready(binary_dice_loss(p2, t2, reduction="none"))
    ref2 = _reference(p2, t2, reduction="none")
    assert jnp.allclose(out2, ref2, atol=1e-5, rtol=1e-5), (out2, ref2)

    # Case 3: exercise the v7x-style split / clamped-duplicate / tail-mask path.
    p3 = jax.nn.sigmoid(jax.random.normal(k1, (4, 3, 32, 32), jnp.float32))
    t3 = (jax.random.uniform(k2, (4, 3, 32, 32)) > 0.5).astype(jnp.float32)
    out3 = jax.block_until_ready(binary_dice_loss(p3, t3, tile_r=8, num_splits=2))
    ref3 = _reference(p3, t3)
    assert jnp.allclose(out3, ref3, atol=1e-5, rtol=1e-5), (out3, ref3)

    # Case 4: narrow-dtype streaming (bf16 inputs) — halves HBM bytes; loose tolerance.
    p4 = jax.nn.sigmoid(jax.random.normal(k3, (2, 8, 16, 16), jnp.float32))
    t4 = (jax.random.uniform(k4, (2, 8, 16, 16)) > 0.5).astype(jnp.float32)
    out4 = jax.block_until_ready(
        binary_dice_loss(p4, t4, pred_dtype=jnp.bfloat16, target_dtype=jnp.bfloat16))
    ref4 = _reference(p4, t4)
    assert jnp.allclose(out4, ref4, atol=3e-2, rtol=3e-2), (out4, ref4)

    print("KERNEL_OK")
</pallas_src>

<mosaic_0001>
module attributes {stable_mosaic.version = 11 : i64} {
  func.func @_dice_partial_kernel(%arg0: i32, %arg1: i32, %arg2: i32, %arg3: memref<2x8x128xf32, #tpu.memory_space<vmem>>, %arg4: memref<2x8x128xf32, #tpu.memory_space<vmem>>, %arg5: memref<1x2x8x128xf32, #tpu.memory_space<vmem>>, %arg6: memref<1x2x8x128xf32, #tpu.memory_space<vmem>>) attributes {dimension_semantics = [#tpu.dimension_semantics<parallel>, #tpu.dimension_semantics<parallel>, #tpu.dimension_semantics<arbitrary>], iteration_bounds = array<i64: 1, 1, 1>, scalar_prefetch = 0 : i64, scratch_operands = 0 : i64, tpu.core_type = #tpu.core_type<tc>, window_params = [{transform_indices = @transform_0, window_bounds = array<i64: 2, 8, 128>}, {transform_indices = @transform_1, window_bounds = array<i64: 2, 8, 128>}, {transform_indices = @transform_2, window_bounds = array<i64: 1, 2, 8, 128>}, {transform_indices = @transform_3, window_bounds = array<i64: 1, 2, 8, 128>}]} {
    %c0_i32 = arith.constant 0 : i32
    %0 = arith.cmpi eq, %arg2, %c0_i32 : i32
    %1 = arith.extui %0 : i1 to i32
    %c0_i32_0 = arith.constant 0 : i32
    %2 = arith.cmpi ne, %1, %c0_i32_0 : i32
    scf.if %2 {
      %cst_23 = arith.constant 0.000000e+00 : f32
      %25 = vector.broadcast %cst_23 : f32 to vector<2x8x128xf32>
      %c0_24 = arith.constant 0 : index
      %c0_25 = arith.constant 0 : index
      %c0_26 = arith.constant 0 : index
      %c0_27 = arith.constant 0 : index
      %26 = vector.load %arg5[%c0_24, %c0_25, %c0_26, %c0_27] : memref<1x2x8x128xf32, #tpu.memory_space<vmem>>, vector<1x2x8x128xf32>
      %27 = vector.shape_cast %26 : vector<1x2x8x128xf32> to vector<2x8x128xf32>
      %28 = vector.shape_cast %25 : vector<2x8x128xf32> to vector<1x2x8x128xf32>
      tpu.vector_store %arg5[%c0_24, %c0_25, %c0_26, %c0_27], %28 {strides = array<i32>} : memref<1x2x8x128xf32, #tpu.memory_space<vmem>>, vector<1x2x8x128xf32>,
      %cst_28 = arith.constant 0.000000e+00 : f32
      %29 = vector.broadcast %cst_28 : f32 to vector<2x8x128xf32>
      %c0_29 = arith.constant 0 : index
      %c0_30 = arith.constant 0 : index
      %c0_31 = arith.constant 0 : index
      %c0_32 = arith.constant 0 : index
      %30 = vector.load %arg6[%c0_29, %c0_30, %c0_31, %c0_32] : memref<1x2x8x128xf32, #tpu.memory_space<vmem>>, vector<1x2x8x128xf32>
      %31 = vector.shape_cast %30 : vector<1x2x8x128xf32> to vector<2x8x128xf32>
      %32 = vector.shape_cast %29 : vector<2x8x128xf32> to vector<1x2x8x128xf32>
      tpu.vector_store %arg6[%c0_29, %c0_30, %c0_31, %c0_32], %32 {strides = array<i32>} : memref<1x2x8x128xf32, #tpu.memory_space<vmem>>, vector<1x2x8x128xf32>,
    } else {
    }
    %c0 = arith.constant 0 : index
    %c0_1 = arith.constant 0 : index
    %c0_2 = arith.constant 0 : index
    %3 = vector.load %arg3[%c0, %c0_1, %c0_2] : memref<2x8x128xf32, #tpu.memory_space<vmem>>, vector<2x8x128xf32>
    %c0_3 = arith.constant 0 : index
    %c0_4 = arith.constant 0 : index
    %c0_5 = arith.constant 0 : index
    %4 = vector.load %arg4[%c0_3, %c0_4, %c0_5] : memref<2x8x128xf32, #tpu.memory_space<vmem>>, vector<2x8x128xf32>
    %5 = arith.mulf %3, %4 : vector<2x8x128xf32>
    %6 = arith.mulf %3, %3 : vector<2x8x128xf32>
    %7 = arith.mulf %4, %4 : vector<2x8x128xf32>
    %8 = arith.addf %6, %7 : vector<2x8x128xf32>
    %c0_6 = arith.constant 0 : index
    %c0_7 = arith.constant 0 : index
    %c0_8 = arith.constant 0 : index
    %c0_9 = arith.constant 0 : index
    %9 = vector.load %arg5[%c0_6, %c0_7, %c0_8, %c0_9] : memref<1x2x8x128xf32, #tpu.memory_space<vmem>>, vector<1x2x8x128xf32>
    %10 = vector.shape_cast %9 : vector<1x2x8x128xf32> to vector<2x8x128xf32>
    %11 = vector.shape_cast %5 : vector<2x8x128xf32> to vector<2x1x8x128xf32>
    %cst = arith.constant dense<0.000000e+00> : vector<2x8x128xf32>
    %12 = vector.multi_reduction <add>, %11, %cst [1] : vector<2x1x8x128xf32> to vector<2x8x128xf32>
    %13 = arith.addf %10, %12 : vector<2x8x128xf32>
    %c0_10 = arith.constant 0 : index
    %c0_11 = arith.constant 0 : index
    %c0_12 = arith.constant 0 : index
    %c0_13 = arith.constant 0 : index
    %14 = vector.load %arg5[%c0_10, %c0_11, %c0_12, %c0_13] : memref<1x2x8x128xf32, #tpu.memory_space<vmem>>, vector<1x2x8x128xf32>
    %15 = vector.shape_cast %14 : vector<1x2x8x128xf32> to vector<2x8x128xf32>
    %16 = vector.shape_cast %13 : vector<2x8x128xf32> to vector<1x2x8x128xf32>
    tpu.vector_store %arg5[%c0_10, %c0_11, %c0_12, %c0_13], %16 {strides = array<i32>} : memref<1x2x8x128xf32, #tpu.memory_space<vmem>>, vector<1x2x8x128xf32>,
    %c0_14 = arith.constant 0 : index
    %c0_15 = arith.constant 0 : index
    %c0_16 = arith.constant 0 : index
    %c0_17 = arith.constant 0 : index
    %17 = vector.load %arg6[%c0_14, %c0_15, %c0_16, %c0_17] : memref<1x2x8x128xf32, #tpu.memory_space<vmem>>, vector<1x2x8x128xf32>
    %18 = vector.shape_cast %17 : vector<1x2x8x128xf32> to vector<2x8x128xf32>
    %19 = vector.shape_cast %8 : vector<2x8x128xf32> to vector<2x1x8x128xf32>
    %cst_18 = arith.constant dense<0.000000e+00> : vector<2x8x128xf32>
    %20 = vector.multi_reduction <add>, %19, %cst_18 [1] : vector<2x1x8x128xf32> to vector<2x8x128xf32>
    %21 = arith.addf %18, %20 : vector<2x8x128xf32>
    %c0_19 = arith.constant 0 : index
    %c0_20 = arith.constant 0 : index
    %c0_21 = arith.constant 0 : index
    %c0_22 = arith.constant 0 : index
    %22 = vector.load %arg6[%c0_19, %c0_20, %c0_21, %c0_22] : memref<1x2x8x128xf32, #tpu.memory_space<vmem>>, vector<1x2x8x128xf32>
    %23 = vector.shape_cast %22 : vector<1x2x8x128xf32> to vector<2x8x128xf32>
    %24 = vector.shape_cast %21 : vector<2x8x128xf32> to vector<1x2x8x128xf32>
    tpu.vector_store %arg6[%c0_19, %c0_20, %c0_21, %c0_22], %24 {strides = array<i32>} : memref<1x2x8x128xf32, #tpu.memory_space<vmem>>, vector<1x2x8x128xf32>,
    return
  }
  func.func @transform_0(%arg0: i32, %arg1: i32, %arg2: i32) -> (i32, i32, i32) {
    %c1_i32 = arith.constant 1 : i32
    %0 = arith.muli %arg1, %c1_i32 : i32
    %1 = arith.addi %0, %arg2 : i32
    %c0_i32 = arith.constant 0 : i32
    %2 = arith.minsi %1, %c0_i32 : i32
    %c0_i32_0 = arith.constant 0 : i32
    %c0_i32_1 = arith.constant 0 : i32
    return %arg0, %2, %c0_i32_0 : i32, i32, i32
  }
  func.func @transform_1(%arg0: i32, %arg1: i32, %arg2: i32) -> (i32, i32, i32) {
    %c1_i32 = arith.constant 1 : i32
    %0 = arith.muli %arg1, %c1_i32 : i32
    %1 = arith.addi %0, %arg2 : i32
    %c0_i32 = arith.constant 0 : i32
    %2 = arith.minsi %1, %c0_i32 : i32
    %c0_i32_0 = arith.constant 0 : i32
    %c0_i32_1 = arith.constant 0 : i32
    return %arg0, %2, %c0_i32_0 : i32, i32, i32
  }
  func.func @transform_2(%arg0: i32, %arg1: i32, %arg2: i32) -> (i32, i32, i32, i32) {
    %c0_i32 = arith.constant 0 : i32
    %c0_i32_0 = arith.constant 0 : i32
    %c0_i32_1 = arith.constant 0 : i32
    return %arg1, %arg0, %c0_i32, %c0_i32_0 : i32, i32, i32, i32
  }
  func.func @transform_3(%arg0: i32, %arg1: i32, %arg2: i32) -> (i32, i32, i32, i32) {
    %c0_i32 = arith.constant 0 : i32
    %c0_i32_0 = arith.constant 0 : i32
    %c0_i32_1 = arith.constant 0 : i32
    return %arg1, %arg0, %c0_i32, %c0_i32_0 : i32, i32, i32, i32
  }
}

</mosaic_0001>

<bundles_post_ra>
// kernel: tpu_custom_call.1
= control target key start
LH: loop header
LB: loop body
LE: loop exit
PB: predicated region body
PF: predicated region fallthrough
CT: control target
= control target key end

     0   :  { %9 = vsyncpa [#allocation3], 0  ;;  %s329_s0 = inlined_call_operand.hbm [shape: f32[2,8,128], index: 0, kind: input, shape index: {}]   ;;  %s330_s1 = inlined_call_operand.hbm [shape: f32[2,8,128], index: 1, kind: input, shape index: {}]   ;;  %s331_s2 = inlined_call_operand.hbm [shape: f32[1,2,8,128], index: 2, kind: output, shape index: {0}]   ;;  %s332_s3 = inlined_call_operand.hbm [shape: f32[1,2,8,128], index: 3, kind: output, shape index: {1}]  }
   0x1   :  { %10 = vsyncpa [#allocation6], 0 }
   0x2   :  { %11 = vsyncpa [#allocation4], 0 }
   0x3   :  { %12 = vsyncpa [#allocation9], 0  ;;  %s236_s12 = smov [#allocation2]   ;;  %s140_s16 = scalar_lea.hbm %s329_s0, 256 }
   0x4   :  { %s23_s13 = sshll.u32 %s236_s12, 4  ;;  %p141_p0 = scmp.ne.s32.totalorder %s329_s0, %s140_s16  ;;  %s24_s13 = int_to_ptr.vmem [resolvable:$true] %s23_s13 }
   0x5   :  { %p144_p1 = scmp.lt.u32.totalorder %s140_s16, %s329_s0 }
   0x7   :  { %p146_p2 = pnand %p144_p1, %p141_p0 }
   0x9   :  { %149 = shalt.err (!%p146_p2)
}
   0xa   :  { %s150_s21 = scalar_lea.vmem %s24_s13, 256  ;;  %p155_p4 = scmp.lt.s32.totalorder %s24_s13, %s24_s13 }
   0xb   :  { %p151_p3 = scmp.ne.s32.totalorder %s24_s13, %s150_s21  ;;  %p156_p5 = scmp.lt.s32.totalorder %s150_s21, %s150_s21 }
   0xd   :  { %p157_p6 = por %p156_p5, %p155_p4 }
   0xf   :  { %p158_p7 = pnand %p157_p6, %p151_p3 }
  0x11   :  { %161 = shalt.err (!%p158_p7)
}
  0x12   :  { %s237_s22 = smov 128   ;;  %s238_s23 = smov 8  }
  0x13   :  { %29 = dma.hbm_to_vmem [thread:$0]  %s329_s0, 256, %s24_s13, [#allocation3], %s237_s22, %s237_s22, %s238_s23  }
  0x14   :  { %s239_s26 = smov [#allocation5]   ;;  %s162_s30 = scalar_lea.hbm %s330_s1, 256 }
  0x15   :  { %s40_s27 = sshll.u32 %s239_s26, 4  ;;  %p163_p8 = scmp.ne.s32.totalorder %s330_s1, %s162_s30  ;;  %s41_s27 = int_to_ptr.vmem [resolvable:$true] %s40_s27 }
  0x16   :  { %p166_p9 = scmp.lt.u32.totalorder %s162_s30, %s330_s1 }
  0x18   :  { %p168_p10 = pnand %p166_p9, %p163_p8 }
  0x1a   :  { %171 = shalt.err (!%p168_p10)
}
  0x1b   :  { %s172_s8 = scalar_lea.vmem %s41_s27, 256  ;;  %p177_p12 = scmp.lt.s32.totalorder %s41_s27, %s41_s27 }
  0x1c   :  { %p173_p11 = scmp.ne.s32.totalorder %s41_s27, %s172_s8  ;;  %p178_p13 = scmp.lt.s32.totalorder %s172_s8, %s172_s8 }
  0x1e   :  { %p179_p0 = por %p178_p13, %p177_p12 }
  0x20   :  { %p180_p1 = pnand %p179_p0, %p173_p11 }
  0x22   :  { %183 = shalt.err (!%p180_p1)
}
  0x23   :  { %46 = dma.hbm_to_vmem [thread:$0]  %s330_s1, 256, %s41_s27, [#allocation6], %s237_s22, %s237_s22, %s238_s23  }
  0x24   :  { %228 = dma.done.wait [#allocation3], 256  }
  0x25   :  { %229 = vsyncadd [#allocation3], 4294967040 }
  0x26   :  { %230 = dma.done.wait [#allocation6], 256  }
  0x27   :  { %231 = vsyncadd [#allocation6], 4294967040  ;;  %v67_v0 = vld [vmem:[#allocation2] sm:$0xff]  ;;  %v69_v1 = vld [vmem:[#allocation5] sm:$0xff]  ;;  %s240_s10 = smov [#allocation7]   ;;  %s241_s12 = smov [#allocation8]  }
  0x28   :  { %v68_v2 = vld [vmem:[#allocation2 + $0x8] sm:$0xff]  ;;  %v71_v3 = vmul.f32 %v69_v1, %v67_v0  ;;  %v70_v4 = vld [vmem:[#allocation5 + $0x8] sm:$0xff]  ;;  %v73_v5 = vmul.f32 %v67_v0, %v67_v0  ;;  %v75_v6 = vmul.f32 %v69_v1, %v69_v1  ;;  %s100_s11 = sshll.u32 %s240_s10, 4  ;;  %s112_s13 = sshll.u32 %s241_s12, 4  ;;  %s101_s11 = int_to_ptr.vmem [resolvable:$true] %s100_s11  ;;  %s292_s13 = int_to_ptr.vmem [resolvable:$true] %s112_s13 }
  0x29   :  { %v74_v7 = vmul.f32 %v68_v2, %v68_v2  ;;  %v72_v8 = vmul.f32 %v70_v4, %v68_v2  ;;  %v76_v9 = vmul.f32 %v70_v4, %v70_v4  ;;  %s184_s1 = scalar_lea.vmem %s101_s11, 256  ;;  %p189_p3 = scmp.lt.s32.totalorder %s101_s11, %s101_s11 }
  0x2a   :  { %v77_v10 = vadd.f32 %v75_v6, %v73_v5  ;;  %85 = vst [vmem:[#allocation7] sm:$0xff] %v71_v3  ;;  %p185_p2 = scmp.ne.s32.totalorder %s101_s11, %s184_s1  ;;  %p190_p4 = scmp.lt.s32.totalorder %s184_s1, %s184_s1 }
  0x2b   :  { %v78_v11 = vadd.f32 %v76_v9, %v74_v7  ;;  %86 = vst [vmem:[#allocation7 + $0x8] sm:$0xff] %v72_v8 }
  0x2c   :  { %93 = vst [vmem:[#allocation8] sm:$0xff] %v77_v10  ;;  %p191_p5 = por %p190_p4, %p189_p3 }
  0x2e   :  { %p192_p6 = pnand %p191_p5, %p185_p2 }
  0x30   :  { %195 = shalt.err (!%p192_p6)
}
  0x31   :  { %s196_s16 = scalar_lea.hbm %s331_s2, 256 }
  0x32   :  { %p197_p7 = scmp.ne.s32.totalorder %s331_s2, %s196_s16  ;;  %p200_p8 = scmp.lt.u32.totalorder %s196_s16, %s331_s2 }
  0x34   :  { %p202_p9 = pnand %p200_p8, %p197_p7 }
  0x36   :  { %205 = shalt.err (!%p202_p9)
}
  0x37   :  { %106 = dma.vmem_to_hbm [thread:$0]  %s101_s11, 256, %s331_s2, [#allocation4], %s237_s22, %s237_s22, %s238_s23   ;;  %94 = vst [vmem:[#allocation8 + $0x8] sm:$0xff] %v78_v11 }
  0x38   :  { %s206_s25 = scalar_lea.vmem %s292_s13, 256  ;;  %p211_p11 = scmp.lt.s32.totalorder %s292_s13, %s292_s13 }
  0x39   :  { %p207_p10 = scmp.ne.s32.totalorder %s292_s13, %s206_s25  ;;  %p212_p12 = scmp.lt.s32.totalorder %s206_s25, %s206_s25 }
  0x3b   :  { %p213_p13 = por %p212_p12, %p211_p11 }
  0x3d   :  { %p214_p0 = pnand %p213_p13, %p207_p10 }
  0x3f   :  { %217 = shalt.err (!%p214_p0)
}
  0x40   :  { %s218_s28 = scalar_lea.hbm %s332_s3, 256 }
  0x41   :  { %p219_p1 = scmp.ne.s32.totalorder %s332_s3, %s218_s28  ;;  %p222_p2 = scmp.lt.u32.totalorder %s218_s28, %s332_s3 }
  0x43   :  { %p224_p3 = pnand %p222_p2, %p219_p1 }
  0x45   :  { %227 = shalt.err (!%p224_p3)
}
  0x46   :  { %118 = dma.vmem_to_hbm [thread:$0]  %s292_s13, 256, %s332_s3, [#allocation9], %s237_s22, %s237_s22, %s238_s23  }
  0x47   :  { %232 = dma.done.wait [#allocation4], 256  }
  0x48   :  { %233 = vsyncadd [#allocation4], 4294967040 }
  0x49   :  { %234 = dma.done.wait [#allocation9], 256  }
  0x4a   :  { %235 = vsyncadd [#allocation9], 4294967040 }
  0x4b   :  { %125 = vsyncpa [#allocation3], 1 }
  0x4c   :  { %126 = vsyncpa [#allocation6], 1 }
  0x4d   :  { %127 = vsyncpa [#allocation4], 1 }
  0x4e   :  { %128 = vsyncpa [#allocation9], 1 }

</bundles_post_ra>
